<compile_context>
chip_gen: v7x
topology: tpu7x:2x2x1
jax: 0.10.0
libtpu: 0.0.40
codegen_flags: <defaults>
</compile_context>

<pallas_src>
import functools

import jax
import jax.numpy as jnp
from jax import lax
from jax.experimental import pallas as pl
from jax.experimental.pallas import tpu as pltpu

_NB_PAD = 128      # lane-padded bin axis (n_bins <= 128)
_NUM_CORES = 2     # leading 'parallel' grid axis (v7x megacore; no-op on 1-TC chips)


def _ece_stats_kernel(logits_ref, labels_ref, out_ref, *,
                      inv_temp, n_total, n_bins, steps_per_core, needs_mask):
    core = pl.program_id(0)
    step = pl.program_id(1)

    # Zero this core's resident accumulator at the start of its sweep.
    @pl.when(step == 0)
    def _():
        out_ref[...] = jnp.zeros_like(out_ref)

    logits = logits_ref[...].astype(jnp.float32)                      # (TN, C)
    if inv_temp != 1.0:                                               # static fold
        logits = logits * inv_temp
    tn, c = logits.shape

    # softmax max-prob without materializing the softmax:
    #   conf = exp(m - m) / sum(exp(x - m)) = 1 / sum(exp(x - m))
    m = jnp.max(logits, axis=1, keepdims=True)                        # (TN, 1)
    denom = jnp.sum(jnp.exp(logits - m), axis=1, keepdims=True)       # (TN, 1)
    conf = pl.reciprocal(denom)                                       # exact 1/denom

    # predictions = first argmax of the scaled logits (exp is monotone, so this
    # matches argmax of the softmax; tie-to-first semantics preserved).
    col = lax.broadcasted_iota(jnp.int32, (tn, c), 1)
    pred = jnp.min(jnp.where(logits == m, col, c), axis=1, keepdims=True)  # (TN, 1)
    acc = (pred == labels_ref[...]).astype(jnp.float32)               # (TN, 1)

    if needs_mask:
        # Rows past N (ragged final tile and clamped fully-OOB tiles): force
        # conf to 0.  conf == 0 satisfies no bin (bin 0 is the open interval
        # (0, 1/n_bins]), so those rows contribute nothing to any statistic.
        row_start = (core * steps_per_core + step) * tn
        row = row_start + lax.broadcasted_iota(jnp.int32, (tn, 1), 0)  # (TN, 1)
        conf = jnp.where(row < n_total, conf, 0.0)

    # Bin boundaries generated in-kernel, lane-padded to 128.  Padded lanes are
    # disabled by lifting their lower bound above 1.0 (conf <= 1 always).
    bidx = lax.broadcasted_iota(jnp.int32, (1, _NB_PAD), 1)           # (1, 128)
    bf = bidx.astype(jnp.float32)
    inv_nb = 1.0 / float(n_bins)
    lowers = jnp.where(bidx < n_bins, bf * inv_nb, 2.0)
    uppers = (bf + 1.0) * inv_nb

    in_bin = ((conf > lowers) & (conf <= uppers)).astype(jnp.float32)  # (TN, 128)

    # Single fused accumulation of the three stat rows into the resident block.
    stats = jnp.concatenate(
        [jnp.sum(in_bin, axis=0, keepdims=True),            # counts
         jnp.sum(in_bin * conf, axis=0, keepdims=True),      # conf sums
         jnp.sum(in_bin * acc, axis=0, keepdims=True)],      # acc sums
        axis=0)                                               # (3, 128)
    out_ref[...] += stats


def _choose_row_tile(n, c):
    """Largest row tile such that the double-buffered logits tile stays well
    inside a 32 MiB scoped VMEM limit on every TPU generation (incl. v7x)."""
    budget = 4 * 1024 * 1024                       # one logits tile (x2 for dbl-buffer)
    cap = max(8, min(budget // max(1, 4 * c), 4096))
    if n <= cap:
        return n                                   # single full-extent block
    return max(8, (cap // 8) * 8)                  # keep the (8, .) sublane constraint


def ece_loss(logits, labels, *, n_bins=20, temperature=1.0):
    """Pallas implementation of ECELoss.forward.

    Returns (ece, ys): ece is a shape-(1,) float32 array; ys is a length-n_bins
    float32 array of per-bin accuracies (0.0 for empty bins), mirroring the
    torch module's (ece, ys-list) convention.
    """
    n, c = logits.shape
    assert n_bins <= _NB_PAD, "n_bins must be <= 128"
    labels2d = labels.astype(jnp.int32).reshape(n, 1)

    tn = _choose_row_tile(n, c)
    nblocks = pl.cdiv(n, tn)
    steps = pl.cdiv(nblocks, _NUM_CORES)
    # Masking is only compiled in when some (core, step) slot maps to rows >= N.
    needs_mask = (n % tn != 0) or (_NUM_CORES * steps != nblocks)

    def row_map(core, step):
        # Clamp fully-out-of-range tiles to the last valid block; the kernel's
        # row mask (based on the unclamped logical index) zeroes their effect.
        blk = jnp.minimum(core * steps + step, nblocks - 1)
        return (blk, 0)

    kernel = functools.partial(
        _ece_stats_kernel,
        inv_temp=1.0 / float(temperature),
        n_total=n,
        n_bins=n_bins,
        steps_per_core=steps,
        needs_mask=needs_mask,
    )

    stats = pl.pallas_call(
        kernel,
        out_shape=jax.ShapeDtypeStruct((_NUM_CORES, 3, _NB_PAD), jnp.float32),
        grid_spec=pltpu.PrefetchScalarGridSpec(
            num_scalar_prefetch=0,
            grid=(_NUM_CORES, steps),
            in_specs=[
                pl.BlockSpec((tn, c), row_map),      # logits row tile
                pl.BlockSpec((tn, 1), row_map),      # labels row tile
            ],
            out_specs=pl.BlockSpec((None, 3, _NB_PAD),
                                   lambda core, step: (core, 0, 0)),
        ),
        compiler_params=pltpu.CompilerParams(
            dimension_semantics=("parallel", "arbitrary"),
            vmem_limit_bytes=32 * 1024 * 1024,
        ),
    )(logits, labels2d)

    # Scalar epilogue in JAX glue (O(n_bins)).
    stats = jnp.sum(stats, axis=0)                   # (3, 128) — sum the core partials
    counts = stats[0, :n_bins]
    conf_sum = stats[1, :n_bins]
    acc_sum = stats[2, :n_bins]

    nonempty = counts > 0
    safe_counts = jnp.where(nonempty, counts, 1.0)
    prop_in_bin = counts / jnp.float32(n)
    avg_conf_in_bin = conf_sum / safe_counts
    acc_in_bin = jnp.where(nonempty, acc_sum / safe_counts, 0.0)

    ece = jnp.sum(
        jnp.where(nonempty,
                  jnp.abs(avg_conf_in_bin - acc_in_bin) * prop_in_bin,
                  0.0)
    ).reshape(1)

    # TODO(synk): torch returns `ys` as a Python list built with .item() host
    # syncs; here it is a device array of per-bin accuracies instead.
    return ece, acc_in_bin


if __name__ == "__main__":
    N, C, NB = 64, 16, 20
    key = jax.random.PRNGKey(0)
    k_logits, k_labels = jax.random.split(key)
    logits = jax.random.normal(k_logits, (N, C), dtype=jnp.float32)
    labels = jax.random.randint(k_labels, (N,), 0, C, dtype=jnp.int32)

    ece, ys = ece_loss(logits, labels, n_bins=NB, temperature=1.0)
    ece = jax.block_until_ready(ece)
    ys = jax.block_until_ready(ys)

    # Pure-JAX reference for a sanity check.
    sm = jax.nn.softmax(logits, axis=1)
    conf = jnp.max(sm, axis=1)
    pred = jnp.argmax(sm, axis=1)
    accs = (pred == labels).astype(jnp.float32)
    lowers = jnp.arange(NB, dtype=jnp.float32) / NB
    uppers = (jnp.arange(NB, dtype=jnp.float32) + 1.0) / NB
    in_bin = (conf[:, None] > lowers[None, :]) & (conf[:, None] <= uppers[None, :])
    cnt = jnp.sum(in_bin, axis=0).astype(jnp.float32)
    nonempty = cnt > 0
    safe = jnp.where(nonempty, cnt, 1.0)
    acc_b = jnp.where(nonempty, jnp.sum(in_bin * accs[:, None], axis=0) / safe, 0.0)
    conf_b = jnp.sum(in_bin * conf[:, None], axis=0) / safe
    ece_ref = jnp.sum(jnp.where(nonempty,
                                jnp.abs(conf_b - acc_b) * (cnt / N), 0.0))

    assert ece.shape == (1,) and ys.shape == (NB,)
    assert abs(float(ece[0]) - float(ece_ref)) < 1e-5
    assert float(jnp.max(jnp.abs(ys - acc_b))) < 1e-5
    print("KERNEL_OK")
</pallas_src>

<mosaic_0001>
module attributes {stable_mosaic.version = 11 : i64} {
  func.func @_ece_stats_kernel(%arg0: i32, %arg1: i32, %arg2: memref<64x16xf32, #tpu.memory_space<vmem>>, %arg3: memref<64x1xi32, #tpu.memory_space<vmem>>, %arg4: memref<1x3x128xf32, #tpu.memory_space<vmem>>) attributes {dimension_semantics = [#tpu.dimension_semantics<parallel>, #tpu.dimension_semantics<arbitrary>], iteration_bounds = array<i64: 2, 1>, scalar_prefetch = 0 : i64, scratch_operands = 0 : i64, tpu.core_type = #tpu.core_type<tc>, window_params = [{transform_indices = @transform_0, window_bounds = array<i64: 64, 16>}, {transform_indices = @transform_1, window_bounds = array<i64: 64, 1>}, {transform_indices = @transform_2, window_bounds = array<i64: 1, 3, 128>}]} {
    %c0_i32 = arith.constant 0 : i32
    %0 = arith.cmpi eq, %arg1, %c0_i32 : i32
    %1 = arith.extui %0 : i1 to i32
    %c0_i32_0 = arith.constant 0 : i32
    %2 = arith.cmpi ne, %1, %c0_i32_0 : i32
    scf.if %2 {
      %cst_21 = arith.constant 0.000000e+00 : f32
      %71 = vector.broadcast %cst_21 : f32 to vector<3x128xf32>
      %c0_22 = arith.constant 0 : index
      %c0_23 = arith.constant 0 : index
      %c0_24 = arith.constant 0 : index
      %72 = vector.load %arg4[%c0_22, %c0_23, %c0_24] : memref<1x3x128xf32, #tpu.memory_space<vmem>>, vector<1x3x128xf32>
      %73 = vector.shape_cast %72 : vector<1x3x128xf32> to vector<3x128xf32>
      %74 = vector.shape_cast %71 : vector<3x128xf32> to vector<1x3x128xf32>
      tpu.vector_store %arg4[%c0_22, %c0_23, %c0_24], %74 {strides = array<i32>} : memref<1x3x128xf32, #tpu.memory_space<vmem>>, vector<1x3x128xf32>,
    } else {
    }
    %c0 = arith.constant 0 : index
    %c0_1 = arith.constant 0 : index
    %3 = vector.load %arg2[%c0, %c0_1] : memref<64x16xf32, #tpu.memory_space<vmem>>, vector<64x16xf32>
    %cst = arith.constant dense<0xFF800000> : vector<64xf32>
    %4 = vector.multi_reduction <maximumf>, %3, %cst [1] : vector<64x16xf32> to vector<64xf32>
    %5 = vector.shape_cast %4 : vector<64xf32> to vector<64x1xf32>
    %6 = vector.broadcast %5 : vector<64x1xf32> to vector<64x16xf32>
    %7 = arith.subf %3, %6 : vector<64x16xf32>
    %8 = math.exp %7 : vector<64x16xf32>
    %cst_2 = arith.constant dense<0.000000e+00> : vector<64xf32>
    %9 = vector.multi_reduction <add>, %8, %cst_2 [1] : vector<64x16xf32> to vector<64xf32>
    %10 = vector.shape_cast %9 : vector<64xf32> to vector<64x1xf32>
    %11 = tpu.reciprocal %10 : vector<64x1xf32> -> vector<64x1xf32>
    %12 = tpu.iota {dimensions = array<i32: 1>} : vector<64x16xi32>
    %13 = vector.broadcast %5 : vector<64x1xf32> to vector<64x16xf32>
    %14 = arith.cmpf oeq, %3, %13 : vector<64x16xf32>
    %c16_i32 = arith.constant 16 : i32
    %15 = vector.broadcast %c16_i32 : i32 to vector<64x16xi32>
    %16 = arith.select %14, %12, %15 : vector<64x16xi1>, vector<64x16xi32>
    %cst_3 = arith.constant dense<2147483647> : vector<64xi32>
    %17 = vector.multi_reduction <minsi>, %16, %cst_3 [1] : vector<64x16xi32> to vector<64xi32>
    %18 = vector.shape_cast %17 : vector<64xi32> to vector<64x1xi32>
    %c0_4 = arith.constant 0 : index
    %c0_5 = arith.constant 0 : index
    %19 = vector.load %arg3[%c0_4, %c0_5] : memref<64x1xi32, #tpu.memory_space<vmem>>, vector<64x1xi32>
    %20 = arith.cmpi eq, %18, %19 : vector<64x1xi32>
    %21 = arith.extui %20 : vector<64x1xi1> to vector<64x1xi32>
    %22 = arith.sitofp %21 : vector<64x1xi32> to vector<64x1xf32>
    %c1_i32 = arith.constant 1 : i32
    %23 = arith.muli %arg0, %c1_i32 : i32
    %24 = arith.addi %23, %arg1 : i32
    %c64_i32 = arith.constant 64 : i32
    %25 = arith.muli %24, %c64_i32 : i32
    %26 = tpu.iota {dimensions = array<i32: 0>} : vector<64x1xi32>
    %27 = vector.broadcast %25 : i32 to vector<64x1xi32>
    %28 = arith.addi %27, %26 : vector<64x1xi32>
    %c64_i32_6 = arith.constant 64 : i32
    %29 = vector.broadcast %c64_i32_6 : i32 to vector<64x1xi32>
    %30 = arith.cmpi slt, %28, %29 : vector<64x1xi32>
    %cst_7 = arith.constant 0.000000e+00 : f32
    %31 = vector.broadcast %cst_7 : f32 to vector<64x1xf32>
    %32 = arith.select %30, %11, %31 : vector<64x1xi1>, vector<64x1xf32>
    %33 = tpu.iota {dimensions = array<i32: 1>} : vector<1x128xi32>
    %34 = arith.sitofp %33 : vector<1x128xi32> to vector<1x128xf32>
    %c20_i32 = arith.constant 20 : i32
    %35 = vector.broadcast %c20_i32 : i32 to vector<1x128xi32>
    %36 = arith.cmpi slt, %33, %35 : vector<1x128xi32>
    %cst_8 = arith.constant 5.000000e-02 : f32
    %37 = vector.broadcast %cst_8 : f32 to vector<1x128xf32>
    %38 = arith.mulf %34, %37 : vector<1x128xf32>
    %cst_9 = arith.constant 2.000000e+00 : f32
    %39 = vector.broadcast %cst_9 : f32 to vector<1x128xf32>
    %40 = arith.select %36, %38, %39 : vector<1x128xi1>, vector<1x128xf32>
    %cst_10 = arith.constant 1.000000e+00 : f32
    %41 = vector.broadcast %cst_10 : f32 to vector<1x128xf32>
    %42 = arith.addf %34, %41 : vector<1x128xf32>
    %cst_11 = arith.constant 5.000000e-02 : f32
    %43 = vector.broadcast %cst_11 : f32 to vector<1x128xf32>
    %44 = arith.mulf %42, %43 : vector<1x128xf32>
    %45 = vector.broadcast %32 : vector<64x1xf32> to vector<64x128xf32>
    %46 = vector.broadcast %40 : vector<1x128xf32> to vector<64x128xf32>
    %47 = arith.cmpf ogt, %45, %46 : vector<64x128xf32>
    %48 = vector.broadcast %32 : vector<64x1xf32> to vector<64x128xf32>
    %49 = vector.broadcast %44 : vector<1x128xf32> to vector<64x128xf32>
    %50 = arith.cmpf ole, %48, %49 : vector<64x128xf32>
    %51 = arith.andi %47, %50 : vector<64x128xi1>
    %52 = arith.extui %51 : vector<64x128xi1> to vector<64x128xi32>
    %53 = arith.sitofp %52 : vector<64x128xi32> to vector<64x128xf32>
    %cst_12 = arith.constant dense<0.000000e+00> : vector<128xf32>
    %54 = vector.multi_reduction <add>, %53, %cst_12 [0] : vector<64x128xf32> to vector<128xf32>
    %55 = vector.shape_cast %54 : vector<128xf32> to vector<1x128xf32>
    %56 = vector.broadcast %32 : vector<64x1xf32> to vector<64x128xf32>
    %57 = arith.mulf %53, %56 : vector<64x128xf32>
    %cst_13 = arith.constant dense<0.000000e+00> : vector<128xf32>
    %58 = vector.multi_reduction <add>, %57, %cst_13 [0] : vector<64x128xf32> to vector<128xf32>
    %59 = vector.shape_cast %58 : vector<128xf32> to vector<1x128xf32>
    %60 = vector.broadcast %22 : vector<64x1xf32> to vector<64x128xf32>
    %61 = arith.mulf %53, %60 : vector<64x128xf32>
    %cst_14 = arith.constant dense<0.000000e+00> : vector<128xf32>
    %62 = vector.multi_reduction <add>, %61, %cst_14 [0] : vector<64x128xf32> to vector<128xf32>
    %63 = vector.shape_cast %62 : vector<128xf32> to vector<1x128xf32>
    %64 = tpu.concatenate %55, %59, %63 in 0 : vector<1x128xf32>, vector<1x128xf32>, vector<1x128xf32> -> vector<3x128xf32>
    %c0_15 = arith.constant 0 : index
    %c0_16 = arith.constant 0 : index
    %c0_17 = arith.constant 0 : index
    %65 = vector.load %arg4[%c0_15, %c0_16, %c0_17] : memref<1x3x128xf32, #tpu.memory_space<vmem>>, vector<1x3x128xf32>
    %66 = vector.shape_cast %65 : vector<1x3x128xf32> to vector<3x128xf32>
    %67 = arith.addf %66, %64 : vector<3x128xf32>
    %c0_18 = arith.constant 0 : index
    %c0_19 = arith.constant 0 : index
    %c0_20 = arith.constant 0 : index
    %68 = vector.load %arg4[%c0_18, %c0_19, %c0_20] : memref<1x3x128xf32, #tpu.memory_space<vmem>>, vector<1x3x128xf32>
    %69 = vector.shape_cast %68 : vector<1x3x128xf32> to vector<3x128xf32>
    %70 = vector.shape_cast %67 : vector<3x128xf32> to vector<1x3x128xf32>
    tpu.vector_store %arg4[%c0_18, %c0_19, %c0_20], %70 {strides = array<i32>} : memref<1x3x128xf32, #tpu.memory_space<vmem>>, vector<1x3x128xf32>,
    return
  }
  func.func @transform_0(%arg0: i32, %arg1: i32) -> (i32, i32) {
    %c1_i32 = arith.constant 1 : i32
    %0 = arith.muli %arg0, %c1_i32 : i32
    %1 = arith.addi %0, %arg1 : i32
    %c0_i32 = arith.constant 0 : i32
    %2 = arith.minsi %1, %c0_i32 : i32
    %c0_i32_0 = arith.constant 0 : i32
    %c0_i32_1 = arith.constant 0 : i32
    return %2, %c0_i32_0 : i32, i32
  }
  func.func @transform_1(%arg0: i32, %arg1: i32) -> (i32, i32) {
    %c1_i32 = arith.constant 1 : i32
    %0 = arith.muli %arg0, %c1_i32 : i32
    %1 = arith.addi %0, %arg1 : i32
    %c0_i32 = arith.constant 0 : i32
    %2 = arith.minsi %1, %c0_i32 : i32
    %c0_i32_0 = arith.constant 0 : i32
    %c0_i32_1 = arith.constant 0 : i32
    return %2, %c0_i32_0 : i32, i32
  }
  func.func @transform_2(%arg0: i32, %arg1: i32) -> (i32, i32, i32) {
    %c0_i32 = arith.constant 0 : i32
    %c0_i32_0 = arith.constant 0 : i32
    %c0_i32_1 = arith.constant 0 : i32
    return %arg0, %c0_i32, %c0_i32_0 : i32, i32, i32
  }
}

</mosaic_0001>

<bundles_post_ra>
// kernel: tpu_custom_call.1
= control target key start
LH: loop header
LB: loop body
LE: loop exit
PB: predicated region body
PF: predicated region fallthrough
CT: control target
= control target key end

     0   :  { %s876_s9 = smov 0   ;;  %s878_s10 = smov 0   ;;  %s1174_s0 = inlined_call_operand.vmem [shape: f32[64,16], index: 0, kind: input, shape index: {}]   ;;  %s1175_s1 = inlined_call_operand.vmem [shape: s32[64,1], index: 1, kind: input, shape index: {}]   ;;  %s1176_s2 = inlined_call_operand.vmem [shape: f32[2,3,128], index: 2, kind: output, shape index: {}]  }
   0x1   :  { %s880_s11 = smov 0  }
   0x2 LB: > { %s24_s12 = sadd.s32 1, %s853_s10  ;;  %p745_p0 = scmp.ge.s32.totalorder %s857_s11, 1  ;;  %s857_s11 = sphi %s880_s11, %s12_s11   ;;  %s853_s10 = sphi %s878_s10, %s1178_s10   ;;  %s849_s9 = sphi %s876_s9, %s1177_s9  }
   0x3   : > { %p26_p1 = scmp.ge.s32.totalorder %s24_s12, 2  ;;  %p160_p2 = scmp.lt.s32.totalorder %s857_s11, 3 }
   0x5   : > { %s1180_s12 = smov (%p26_p1, %s24_s12), 0  ;;  %p161_p3 = pnand %p745_p0, %p160_p2 }
   0x6   : > { %p193_p4 = scmp.lt.s32.totalorder (!%p161_p3), %s849_s9, 0  ;;  %vm233_vm0 = vcmask (!%p161_p3), 130048   ;;  %v314_v16 = vlaneseq (!%p161_p3)  ;;  %p216_p6 = scmp.lt.s32.totalorder (!%p161_p3), %s849_s9, 1 }
   0x7   : > { %164 = sbr.rel (%p161_p3) target bundleno = 637 (0x27d), region = 28  ;;  %s759_s27 = sshll.u32 (!%p161_p3), %s849_s9, 6 }
   0x8   : > { %v939_v17 = vand.u32 (!%p161_p3), 127, %v314_v16 }
   0xe   : > { %s194_s13 = scalar_select %p193_p4, %s849_s9, 0 }
   0xf   : > { %s217_s22 = scalar_select %p216_p6, %s849_s9, 1 }
  0x10   : > { %s746_s14 = sshll.u32 %s194_s13, 3 }
  0x11   : > { %p196_p5 = scmp.lt.s32.totalorder %s746_s14, 7  ;;  %s750_s23 = sshll.u32 %s217_s22, 2 }
  0x12   : > { %s1102_s26 = scalar_lea.vmem %s1176_s2, %s750_s23 }
  0x13   : > { %s1182_s14 = smov (!%p196_p5, %s746_s14), 7 }
  0x14   : > { %s747_s15 = sshll.u32 %s1182_s14, 3 }
  0x15   : > { %s199_s18 = scalar_lea.vmem %s1174_s0, %s747_s15  ;;  %s1071_s21 = scalar_lea.vmem %s1175_s1, %s747_s15 }
  0x16   : > { %v906_v0 = vld [vmem:[%s199_s18] sm:$0xff]  ;;  %v908_v1 = vld [vmem:[%s199_s18 + $0x10] sm:$0xff]  ;;  %v910_v2 = vld [vmem:[%s199_s18 + $0x8] sm:$0xff] }
  0x17   : > { %v234_v3 = vsel %vm233_vm0, %v906_v0, -inf  ;;  %v240_v4 = vsel %vm233_vm0, %v908_v1, -inf  ;;  %v916_v5 = vld [vmem:[%s199_s18 + $0x18] sm:$0xff]  ;;  %v237_v6 = vsel %vm233_vm0, %v910_v2, -inf  ;;  %v922_v8 = vld [vmem:[%s199_s18 + $0x20] sm:$0xff]  ;;  %v924_v9 = vld [vmem:[%s199_s18 + $0x28] sm:$0xff] }
  0x18   : > { %235 = vmax.xlane.f32.xlu0 %v234_v3  ;;  %241 = vmax.xlane.f32.xlu1 %v240_v4  ;;  %v243_v7 = vsel %vm233_vm0, %v916_v5, -inf  ;;  %v246_v10 = vsel %vm233_vm0, %v922_v8, -inf  ;;  %v249_v11 = vsel %vm233_vm0, %v924_v9, -inf  ;;  %v930_v12 = vld [vmem:[%s199_s18 + $0x30] sm:$0xff]  ;;  %v932_v13 = vld [vmem:[%s199_s18 + $0x38] sm:$0xff] }
  0x19   : > { %v252_v14 = vsel %vm233_vm0, %v930_v12, -inf  ;;  %v255_v15 = vsel %vm233_vm0, %v932_v13, -inf }
  0x1c   : > { %238 = vmax.xlane.f32.xlu0 %v237_v6  ;;  %244 = vmax.xlane.f32.xlu1 %v243_v7 }
  0x20   : > { %247 = vmax.xlane.f32.xlu0 %v246_v10  ;;  %250 = vmax.xlane.f32.xlu1 %v249_v11 }
  0x24   : > { %253 = vmax.xlane.f32.xlu0 %v252_v14  ;;  %256 = vmax.xlane.f32.xlu1 %v255_v15 }
  0xa5   : > { %v941_v18 = vpop.xlane.xlu0 %235  ;;  %v943_v19 = vpop.xlane.xlu1 %241 }
  0xa6   : > { %vm316_vm1 = vcmp.eq.f32.partialorder %v906_v0, %v941_v18  ;;  %vm318_vm2 = vcmp.eq.f32.partialorder %v908_v1, %v943_v19  ;;  %v258_v59 = vsub.f32 %v906_v0, %v941_v18  ;;  %v260_v63 = vsub.f32 %v908_v1, %v943_v19 }
  0xa7   : > { %v324_v20 = vsel %vm316_vm1, %v939_v17, 16  ;;  %v326_v21 = vsel %vm318_vm2, %v939_v17, 16 }
  0xa8   : > { %v332_v22 = vsel %vm233_vm0, %v324_v20, 2147483647  ;;  %v362_v26 = vsel %vm233_vm0, %v326_v21, 2147483647  ;;  %v266_v6 = vmul.f32 1.442695, %v258_v59 }
  0xa9   : > { %v952_v23 = vpop.xlane.xlu0 %238  ;;  %v954_v24 = vpop.xlane.xlu1 %244  ;;  %v334_v25 = vshra.s32 %v332_v22, 16  ;;  %v364_v30 = vshra.s32 %v362_v26, 16  ;;  %v333_v58 = vand.u32 65535, %v332_v22  ;;  %v363_v62 = vand.u32 65535, %v362_v26 }
  0xaa   : > { %vm317_vm3 = vcmp.eq.f32.partialorder %v910_v2, %v952_v23  ;;  %vm319_vm4 = vcmp.eq.f32.partialorder %v916_v5, %v954_v24  ;;  %v259_v7 = vsub.f32 %v910_v2, %v952_v23  ;;  %v270_v0 = vmul.f32 1.442695, %v260_v63 }
  0xab   : > { %v325_v27 = vsel %vm317_vm3, %v939_v17, 16  ;;  %v336_v28 = vcvt.s32.f32 %v334_v25  ;;  %v327_v29 = vsel %vm319_vm4, %v939_v17, 16  ;;  %v366_v36 = vcvt.s32.f32 %v364_v30 }
  0xac   : > { %v347_v33 = vsel %vm233_vm0, %v325_v27, 2147483647  ;;  %v971_v34 = vsel %vm233_vm0, %v327_v29, 2147483647  ;;  %v335_v61 = vcvt.s32.f32 %v333_v58  ;;  %v365_v11 = vcvt.s32.f32 %v363_v62 }
  0xad   : > { %337 = vmin.xlane.f32.xlu0 %v336_v28  ;;  %v963_v31 = vpop.xlane.xlu0 %247  ;;  %v965_v32 = vpop.xlane.xlu1 %250  ;;  %v349_v38 = vshra.s32 %v347_v33, 16  ;;  %v379_v41 = vshra.s32 %v971_v34, 16  ;;  %v348_v4 = vand.u32 65535, %v347_v33  ;;  %v261_v14 = vsub.f32 %v916_v5, %v954_v24 }
  0xae   : > { %vm320_vm5 = vcmp.eq.f32.partialorder %v922_v8, %v963_v31  ;;  %vm321_vm6 = vcmp.eq.f32.partialorder %v924_v9, %v965_v32  ;;  %v262_v15 = vsub.f32 %v922_v8, %v963_v31  ;;  %v378_v20 = vand.u32 65535, %v971_v34 }
  0xaf   : > { %v328_v35 = vsel %vm320_vm5, %v939_v17, 16  ;;  %v329_v37 = vsel %vm321_vm6, %v939_v17, 16  ;;  %v351_v43 = vcvt.s32.f32 %v349_v38  ;;  %v381_v47 = vcvt.s32.f32 %v379_v41 }
  0xb0   : > { %v392_v42 = vsel %vm233_vm0, %v328_v35, 2147483647  ;;  %v986_v44 = vsel %vm233_vm0, %v329_v37, 2147483647  ;;  %v350_v19 = vcvt.s32.f32 %v348_v4  ;;  %803 = vpow2.f32 %v266_v6 }
  0xb1   : > { %367 = vmin.xlane.f32.xlu0 %v366_v36  ;;  %v977_v39 = vpop.xlane.xlu0 %253  ;;  %v979_v40 = vpop.xlane.xlu1 %256  ;;  %352 = vmin.xlane.f32.xlu1 %v351_v43  ;;  %v394_v48 = vshra.s32 %v392_v42, 16  ;;  %v409_v49 = vshra.s32 %v986_v44, 16  ;;  %v393_v2 = vand.u32 65535, %v392_v42  ;;  %v268_v21 = vmul.f32 1.442695, %v259_v7  ;;  %v452_v7 = vld [vmem:[%s1071_s21] sm:$0xff] }
  0xb2   : > { %vm322_vm7 = vcmp.eq.f32.partialorder %v930_v12, %v977_v39  ;;  %vm323_vm8 = vcmp.eq.f32.partialorder %v932_v13, %v979_v40  ;;  %805 = vpow2.f32 %v270_v0  ;;  %v272_v23 = vmul.f32 1.442695, %v261_v14 }
  0xb3   : > { %v330_v45 = vsel %vm322_vm7, %v939_v17, 16  ;;  %v331_v46 = vsel %vm323_vm8, %v939_v17, 16  ;;  %v396_v51 = vcvt.s32.f32 %v394_v48  ;;  %v1000_v54 = vcvt.s32.f32 %v409_v49 }
  0xb4   : > { %v994_v50 = vsel %vm233_vm0, %v330_v45, 2147483647  ;;  %v998_v53 = vsel %vm233_vm0, %v331_v46, 2147483647  ;;  %v274_v25 = vmul.f32 1.442695, %v262_v15  ;;  %v263_v5 = vsub.f32 %v924_v9, %v965_v32 }
  0xb5   : > { %v424_v52 = vshra.s32 %v994_v50, 16  ;;  %382 = vmin.xlane.f32.xlu1 %v381_v47  ;;  %397 = vmin.xlane.f32.xlu0 %v396_v51  ;;  %v439_v56 = vshra.s32 %v998_v53, 16  ;;  %v380_v26 = vcvt.s32.f32 %v378_v20  ;;  %v395_v27 = vcvt.s32.f32 %v393_v2 }
  0xb6   : > { %v423_v29 = vand.u32 65535, %v994_v50  ;;  %807 = vpow2.f32 %v268_v21  ;;  %v264_v30 = vsub.f32 %v930_v12, %v977_v39  ;;  %v276_v32 = vmul.f32 1.442695, %v263_v5 }
  0xb7   : > { %v1002_v55 = vcvt.s32.f32 %v424_v52  ;;  %v1007_v57 = vcvt.s32.f32 %v439_v56  ;;  %809 = vpow2.f32 %v272_v23  ;;  %v438_v37 = vand.u32 65535, %v998_v53 }
  0xb8   : > { %811 = vpow2.f32 %v274_v25  ;;  %v278_v12 = vmul.f32 1.442695, %v264_v30  ;;  %v265_v38 = vsub.f32 %v932_v13, %v979_v40  ;;  %v859_v56 = vmov 0  }
  0xb9   : > { %412 = vmin.xlane.f32.xlu1 %v1000_v54  ;;  %427 = vmin.xlane.f32.xlu0 %v1002_v55  ;;  %813 = vpow2.f32 %v276_v32  ;;  %v860_v5 = vmov 0.0   ;;  %v455_v32 = vld [vmem:[%s1071_s21 + $0x18] sm:$0xff] }
  0xba   : > { %v804_v42 = vpop.eup %803  ;;  %815 = vpow2.f32 %v278_v12  ;;  %v280_v46 = vmul.f32 1.442695, %v265_v38  ;;  %802 = vset.pattern.permute.xlu1 %v859_v56  ;;  %796 = vset.pattern.permute.xlu0 %v859_v56  ;;  %224 = vst [vmem:[%s1102_s26] sm:$0x7] %v860_v5 }
  0xbb   : > { %v282_v40 = vsel %vm233_vm0, %v804_v42, 0.0 }
  0xbc   : > { %v806_v45 = vpop.eup %805  ;;  %817 = vpow2.f32 %v280_v46 }
  0xbd   : > { %442 = vmin.xlane.f32.xlu1 %v1007_v57 }
 0x13a   : > { %v1012_v60 = vpop.xlane.xlu0 %337 }
 0x13b   : > { %vm339_vm9 = vcmp.eq.f32.partialorder %v336_v28, %v1012_v60  ;;  %v408_v28 = vand.u32 65535, %v986_v44  ;;  %v440_v44 = vcvt.s32.f32 %v438_v37  ;;  %v344_v62 = vcvt.f32.s32 %v1012_v60 }
 0x13c   : > { %v340_v3 = vsel %vm339_vm9, %v335_v61, inf }
 0x13d   : > { %341 = vmin.xlane.f32.xlu0 %v340_v3  ;;  %v410_v35 = vcvt.s32.f32 %v408_v28  ;;  %v345_v3 = vshll.u32 %v344_v62, 16 }
 0x13e   : > { %v1019_v10 = vpop.xlane.xlu0 %367  ;;  %v1026_v18 = vpop.xlane.xlu1 %352 }
 0x13f   : > { %vm369_vm10 = vcmp.eq.f32.partialorder %v366_v36, %v1019_v10  ;;  %vm354_vm11 = vcmp.eq.f32.partialorder %v351_v43, %v1026_v18  ;;  %v425_v36 = vcvt.s32.f32 %v423_v29  ;;  %v374_v4 = vcvt.f32.s32 %v1019_v10  ;;  %v453_v10 = vld [vmem:[%s1071_s21 + $0x8] sm:$0xff] }
 0x140   : > { %v370_v1 = vsel %vm369_vm10, %v365_v11, inf  ;;  %v355_v22 = vsel %vm354_vm11, %v350_v19, inf  ;;  %v359_v0 = vcvt.f32.s32 %v1026_v18  ;;  %vm521_vm10 = vcmp.lt.s32.totalorder %v939_v17, 20 }
 0x141   : > { %371 = vmin.xlane.f32.xlu0 %v370_v1  ;;  %356 = vmin.xlane.f32.xlu1 %v355_v22  ;;  %v375_v60 = vshll.u32 %v374_v4, 16  ;;  %v454_v1 = vld [vmem:[%s1071_s21 + $0x10] sm:$0xff]  ;;  %v520_v4 = vcvt.s32.f32 %v939_v17 }
 0x142   : > { %v1032_v8 = vpop.xlane.xlu1 %382  ;;  %v1034_v24 = vpop.xlane.xlu0 %397  ;;  %v360_v22 = vshll.u32 %v359_v0, 16 }
 0x143   : > { %vm384_vm12 = vcmp.eq.f32.partialorder %v381_v47, %v1032_v8  ;;  %vm399_vm13 = vcmp.eq.f32.partialorder %v396_v51, %v1034_v24  ;;  %v808_v47 = vpop.eup %807  ;;  %v288_v51 = vsel %vm233_vm0, %v806_v45, 0.0  ;;  %v389_v19 = vcvt.f32.s32 %v1032_v8  ;;  %v457_v45 = vld [vmem:[%s1071_s21 + $0x28] sm:$0xff] }
 0x144   : > { %v385_v9 = vsel %vm384_vm12, %v380_v26, inf  ;;  %v400_v31 = vsel %vm399_vm13, %v395_v27, inf  ;;  %v810_v48 = vpop.eup %809  ;;  %v285_v50 = vsel %vm233_vm0, %v808_v47, 0.0  ;;  %v404_v20 = vcvt.f32.s32 %v1034_v24 }
 0x145   : > { %386 = vmin.xlane.f32.xlu1 %v385_v9  ;;  %401 = vmin.xlane.f32.xlu0 %v400_v31  ;;  %v812_v49 = vpop.eup %811  ;;  %v291_v53 = vsel %vm233_vm0, %v810_v48, 0.0  ;;  %v390_v26 = vshll.u32 %v389_v19, 16  ;;  %v524_v0 = vadd.f32 1.0, %v520_v4 }
 0x146   : > { %v1042_v33 = vpop.xlane.xlu1 %412  ;;  %v1044_v34 = vpop.xlane.xlu0 %427  ;;  %v405_v27 = vshll.u32 %v404_v20, 16 }
 0x147   : > { %vm414_vm14 = vcmp.eq.f32.partialorder %v1000_v54, %v1042_v33  ;;  %vm429_vm15 = vcmp.eq.f32.partialorder %v1002_v55, %v1044_v34  ;;  %v814_v52 = vpop.eup %813  ;;  %v294_v54 = vsel %vm233_vm0, %v812_v49, 0.0  ;;  %v419_v8 = vcvt.f32.s32 %v1042_v33 }
 0x148   : > { %v415_v39 = vsel %vm414_vm14, %v410_v35, inf  ;;  %v430_v41 = vsel %vm429_vm15, %v425_v36, inf  ;;  %v816_v55 = vpop.eup %815  ;;  %v456_v35 = vld [vmem:[%s1071_s21 + $0x20] sm:$0xff]  ;;  %v434_v38 = vcvt.f32.s32 %v1044_v34 }
 0x149   : > { %416 = vmin.xlane.f32.xlu1 %v415_v39  ;;  %431 = vmin.xlane.f32.xlu0 %v430_v41  ;;  %v300_v58 = vsel %vm233_vm0, %v816_v55, 0.0  ;;  %v818_v59 = vpop.eup %817  ;;  %v420_v42 = vshll.u32 %v419_v8, 16  ;;  %v459_v55 = vld [vmem:[%s1071_s21 + $0x38] sm:$0xff] }
 0x14a   : > { %v1053_v43 = vpop.xlane.xlu1 %442  ;;  %v303_v61 = vsel %vm233_vm0, %v818_v59, 0.0  ;;  %v435_v47 = vshll.u32 %v434_v38, 16  ;;  %v1107_v59 = vshrl.u32 %v314_v16, 7 }
 0x14b   : > { %vm444_vm1 = vcmp.eq.f32.partialorder %v1007_v57, %v1053_v43  ;;  %v297_v57 = vsel %vm233_vm0, %v814_v52, 0.0  ;;  %v449_v48 = vcvt.f32.s32 %v1053_v43 }
 0x14c   : > { %v445_v13 = vsel %vm444_vm1, %v440_v44, inf  ;;  %v492_v17 = vadd.s32 40, %v1107_v59 }
 0x14d   : > { %446 = vmin.xlane.f32.xlu1 %v445_v13  ;;  %283 = vadd.xlane.f32.xlu0 %v282_v40  ;;  %v450_v52 = vshll.u32 %v449_v48, 16 }
 0x151   : > { %286 = vadd.xlane.f32.xlu1 %v285_v50  ;;  %289 = vadd.xlane.f32.xlu0 %v288_v51  ;;  %v458_v51 = vld [vmem:[%s1071_s21 + $0x30] sm:$0xff] }
 0x155   : > { %292 = vadd.xlane.f32.xlu1 %v291_v53  ;;  %295 = vadd.xlane.f32.xlu0 %v294_v54 }
 0x159   : > { %298 = vadd.xlane.f32.xlu1 %v297_v57  ;;  %301 = vadd.xlane.f32.xlu0 %v300_v58 }
 0x15d   : > { %304 = vadd.xlane.f32.xlu1 %v303_v61  ;;  %v488_v61 = vadd.s32 8, %v1107_v59 }
 0x1ca   : > { %v342_v63 = vpop.xlane.xlu0 %341 }
 0x1cb   : > { %v343_v6 = vcvt.f32.s32 %v342_v63 }
 0x1cd   : > { %v346_v11 = vadd.s32 %v345_v3, %v343_v6  ;;  %v1111_v3 = vstv %s759_s27 }
 0x1ce   : > { %v372_v14 = vpop.xlane.xlu0 %371  ;;  %v357_v2 = vpop.xlane.xlu1 %356  ;;  %v497_v6 = vadd.s32 %v1111_v3, %v488_v61  ;;  %v496_v16 = vadd.s32 %v1111_v3, %v1107_v59 }
 0x1cf   : > { %vm460_vm0 = vcmp.eq.s32.totalorder %v346_v11, %v452_v7  ;;  %v373_v15 = vcvt.f32.s32 %v372_v14  ;;  %v358_v23 = vcvt.f32.s32 %v357_v2  ;;  %v489_v7 = vadd.s32 16, %v1107_v59 }
 0x1d0   : > { %v751_v9 = vsel %vm460_vm0, 1.0, %v860_v5  ;;  %vm505_vm9 = vcmp.lt.s32.totalorder %v497_v6, 64  ;;  %v490_v14 = vadd.s32 24, %v1107_v59  ;;  %vm504_vm11 = vcmp.lt.s32.totalorder %v496_v16, 64 }
 0x1d1   : > { %v376_v21 = vadd.s32 %v375_v60, %v373_v15  ;;  %v361_v25 = vadd.s32 %v360_v22, %v358_v23  ;;  %v522_v15 = vmul.f32 0.05, %v520_v4  ;;  %v498_v19 = vadd.s32 %v1111_v3, %v489_v7 }
 0x1d2   : > { %v387_v28 = vpop.xlane.xlu1 %386  ;;  %v402_v29 = vpop.xlane.xlu0 %401  ;;  %v499_v22 = vadd.s32 %v1111_v3, %v490_v14 }
 0x1d3   : > { %vm462_vm2 = vcmp.eq.s32.totalorder %v376_v21, %v454_v1  ;;  %vm461_vm3 = vcmp.eq.s32.totalorder %v361_v25, %v453_v10  ;;  %v388_v24 = vcvt.f32.s32 %v387_v28  ;;  %v403_v30 = vcvt.f32.s32 %v402_v29 }
 0x1d4   : > { %v753_v18 = vsel %vm462_vm2, 1.0, %v860_v5  ;;  %v752_v31 = vsel %vm461_vm3, 1.0, %v860_v5  ;;  %v1121_v21 = vmul.f32 0.05, %v524_v0  ;;  %v1124_v23 = vsel %vm521_vm10, %v522_v15, 2.0 }
 0x1d5   : > { %612 = vperm.xlu1 %802, %v753_v18   ;;  %v391_v36 = vadd.s32 %v390_v26, %v388_v24  ;;  %v406_v37 = vadd.s32 %v405_v27, %v403_v30  ;;  %v797_v12 = vpack.i.bf16 %v752_v31, %v751_v9  ;;  %v491_v25 = vadd.s32 32, %v1107_v59 }
 0x1d6   : > { %v417_v39 = vpop.xlane.xlu1 %416  ;;  %v432_v41 = vpop.xlane.xlu0 %431  ;;  %vm506_vm12 = vcmp.lt.s32.totalorder %v498_v19, 64  ;;  %vm507_vm0 = vcmp.lt.s32.totalorder %v499_v22, 64  ;;  %v501_v30 = vadd.s32 %v1111_v3, %v492_v17  ;;  %v493_v31 = vadd.s32 48, %v1107_v59 }
 0x1d7   : > { %v418_v33 = vcvt.f32.s32 %v417_v39  ;;  %798 = vperm.xlu0 %796, %v797_v12   ;;  %vm463_vm4 = vcmp.eq.s32.totalorder %v391_v36, %v455_v32  ;;  %vm464_vm5 = vcmp.eq.s32.totalorder %v406_v37, %v456_v35  ;;  %v433_v13 = vcvt.f32.s32 %v432_v41 }
 0x1d8   : > { %v754_v44 = vsel %vm463_vm4, 1.0, %v860_v5  ;;  %v755_v34 = vsel %vm464_vm5, 1.0, %v860_v5  ;;  %v500_v29 = vadd.s32 %v1111_v3, %v491_v25  ;;  %vm509_vm10 = vcmp.lt.s32.totalorder %v501_v30, 64 }
 0x1d9   : > { %v421_v46 = vadd.s32 %v420_v42, %v418_v33  ;;  %617 = vperm.xlu1 %802, %v754_v44   ;;  %v436_v49 = vadd.s32 %v435_v47, %v433_v13  ;;  %v494_v12 = vadd.s32 56, %v1107_v59  ;;  %v502_v42 = vadd.s32 %v1111_v3, %v493_v31 }
 0x1da   : > { %v447_v40 = vpop.xlane.xlu1 %446  ;;  %v284_v57 = vpop.xlane.xlu0 %283 }
 0x1db   : > { %vm465_vm6 = vcmp.eq.s32.totalorder %v421_v46, %v457_v45  ;;  %v448_v50 = vcvt.f32.s32 %v447_v40  ;;  %vm466_vm7 = vcmp.eq.s32.totalorder %v436_v49, %v458_v51  ;;  %v503_v46 = vadd.s32 %v1111_v3, %v494_v12 }
 0x1dc   : > { %v756_v53 = vsel %vm465_vm6, 1.0, %v860_v5  ;;  %v757_v56 = vsel %vm466_vm7, 1.0, %v860_v5  ;;  %vm508_vm6 = vcmp.lt.s32.totalorder %v500_v29, 64 }
 0x1dd   : > { %622 = vperm.xlu1 %802, %v755_v34   ;;  %v451_v54 = vadd.s32 %v450_v52, %v448_v50 }
 0x1de   : > { %v287_v58 = vpop.xlane.xlu1 %286  ;;  %v290_v62 = vpop.xlane.xlu0 %289 }
 0x1df   : > { %vm467_vm8 = vcmp.eq.s32.totalorder %v451_v54, %v459_v55  ;;  %819 = vrcp.f32 %v287_v58 }
 0x1e0   : > { %v758_v43 = vsel %vm467_vm8, 1.0, %v860_v5  ;;  %821 = vrcp.f32 %v284_v57 }
 0x1e1   : > { %627 = vperm.xlu1 %802, %v756_v53   ;;  %823 = vrcp.f32 %v290_v62 }
 0x1e2   : > { %v293_v63 = vpop.xlane.xlu1 %292  ;;  %v296_v60 = vpop.xlane.xlu0 %295 }
 0x1e3   : > { %825 = vrcp.f32 %v293_v63 }
 0x1e4   : > { %827 = vrcp.f32 %v296_v60 }
 0x1e5   : > { %632 = vperm.xlu1 %802, %v757_v56  }
 0x1e6   : > { %v299_v20 = vpop.xlane.xlu1 %298  ;;  %v302_v27 = vpop.xlane.xlu0 %301 }
 0x1e7   : > { %829 = vrcp.f32 %v299_v20 }
 0x1e8   : > { %831 = vrcp.f32 %v302_v27 }
 0x1e9   : > { %637 = vperm.xlu1 %802, %v758_v43   ;;  %v820_v11 = vpop.eup %819 }
 0x1ea   : > { %v822_v1 = vpop.eup %821  ;;  %v513_v2 = vsel %vm505_vm9, %v820_v11, 0.0  ;;  %v305_v8 = vpop.xlane.xlu1 %304 }
 0x1eb   : > { %v512_v10 = vsel %vm504_vm11, %v822_v1, 0.0  ;;  %v824_v18 = vpop.eup %823  ;;  %vm527_vm13 = vcmp.gt.f32.partialorder %v513_v2, %v1124_v23  ;;  %vm535_vm14 = vcmp.le.f32.partialorder %v513_v2, %v1121_v21  ;;  %833 = vrcp.f32 %v305_v8 }
 0x1ec   : > { %vm526_vm15 = vcmp.gt.f32.partialorder %v512_v10, %v1124_v23  ;;  %vm534_vm1 = vcmp.le.f32.partialorder %v512_v10, %v1121_v21  ;;  %v514_v28 = vsel %vm506_vm12, %v824_v18, 0.0  ;;  %vm543_vm2 = vmand %vm527_vm13, %vm535_vm14 }
 0x1ed   : > { %v826_v26 = vpop.eup %825  ;;  %vm542_vm3 = vmand %vm526_vm15, %vm534_vm1  ;;  %vm528_vm4 = vcmp.gt.f32.partialorder %v514_v28, %v1124_v23  ;;  %vm536_vm5 = vcmp.le.f32.partialorder %v514_v28, %v1121_v21  ;;  %v1137_v9 = vsel %vm543_vm2, 1.0, %v860_v5  ;;  %vm510_vm1 = vcmp.lt.s32.totalorder %v502_v42, 64 }
 0x1ee   : > { %v515_v24 = vsel %vm507_vm0, %v826_v26, 0.0  ;;  %v828_v32 = vpop.eup %827  ;;  %v760_v35 = vsel %vm542_vm3, 1.0, %v860_v5  ;;  %vm544_vm9 = vmand %vm528_vm4, %vm536_vm5  ;;  %v580_v36 = vmul.f32 %v1137_v9, %v513_v2  ;;  %vm511_vm2 = vcmp.lt.s32.totalorder %v503_v46, 64 }
 0x1ef   : > { %vm529_vm7 = vcmp.gt.f32.partialorder %v515_v24, %v1124_v23  ;;  %vm537_vm8 = vcmp.le.f32.partialorder %v515_v24, %v1121_v21  ;;  %v579_v38 = vmul.f32 %v760_v35, %v512_v10  ;;  %v516_v39 = vsel %vm508_vm6, %v828_v32, 0.0 }
 0x1f0   : > { %vm545_vm11 = vmand %vm529_vm7, %vm537_vm8  ;;  %v762_v41 = vsel %vm544_vm9, 1.0, %v860_v5  ;;  %vm530_vm12 = vcmp.gt.f32.partialorder %v516_v39, %v1124_v23  ;;  %vm538_vm13 = vcmp.le.f32.partialorder %v516_v39, %v1121_v21  ;;  %v566_v40 = vadd.f32 %v1137_v9, %v760_v35 }
 0x1f1   : > { %v830_v37 = vpop.eup %829  ;;  %v587_v33 = vadd.f32 %v580_v36, %v579_v38  ;;  %v763_v45 = vsel %vm545_vm11, 1.0, %v860_v5  ;;  %v581_v13 = vmul.f32 %v762_v41, %v514_v28  ;;  %vm546_vm0 = vmand %vm530_vm12, %vm538_vm13  ;;  %vm663_vm11 = vcmask 1041408  }
 0x1f2   : > { %v517_v44 = vsel %vm509_vm10, %v830_v37, 0.0  ;;  %v832_v47 = vpop.eup %831  ;;  %v582_v48 = vmul.f32 %v763_v45, %v515_v24  ;;  %v567_v50 = vadd.f32 %v762_v41, %v566_v40  ;;  %v764_v52 = vsel %vm546_vm0, 1.0, %v860_v5 }
 0x1f3   : > { %vm531_vm14 = vcmp.gt.f32.partialorder %v517_v44, %v1124_v23  ;;  %vm539_vm15 = vcmp.le.f32.partialorder %v517_v44, %v1121_v21  ;;  %v588_v34 = vadd.f32 %v587_v33, %v581_v13  ;;  %v518_v51 = vsel %vm510_vm1, %v832_v47, 0.0 }
 0x1f4   : > { %vm547_vm3 = vmand %vm531_vm14, %vm539_vm15  ;;  %vm532_vm4 = vcmp.gt.f32.partialorder %v518_v51, %v1124_v23  ;;  %vm540_vm5 = vcmp.le.f32.partialorder %v518_v51, %v1121_v21  ;;  %v568_v56 = vadd.f32 %v763_v45, %v567_v50  ;;  %v583_v43 = vmul.f32 %v764_v52, %v516_v39 }
 0x1f5   : > { %v834_v49 = vpop.eup %833  ;;  %v589_v53 = vadd.f32 %v588_v34, %v582_v48  ;;  %v765_v55 = vsel %vm547_vm3, 1.0, %v860_v5  ;;  %vm548_vm8 = vmand %vm532_vm4, %vm540_vm5  ;;  %vm661_vm10 = vcmask 1040384   ;;  %v665_v34 = vld [vmem:[%s1102_s26] sm:$0x7] }
 0x1f6   : > { %v519_v54 = vsel %vm511_vm2, %v834_v49, 0.0  ;;  %v584_v58 = vmul.f32 %v765_v55, %v517_v44  ;;  %v569_v61 = vadd.f32 %v764_v52, %v568_v56  ;;  %v766_v62 = vsel %vm548_vm8, 1.0, %v860_v5 }
 0x1f7   : > { %vm533_vm6 = vcmp.gt.f32.partialorder %v519_v54, %v1124_v23  ;;  %vm541_vm7 = vcmp.le.f32.partialorder %v519_v54, %v1121_v21  ;;  %v590_v57 = vadd.f32 %v589_v53, %v583_v43  ;;  %v585_v7 = vmul.f32 %v766_v62, %v518_v51 }
 0x1f8   : > { %vm549_vm9 = vmand %vm533_vm6, %vm541_vm7  ;;  %v570_v6 = vadd.f32 %v765_v55, %v569_v61 }
 0x1f9   : > { %v591_v63 = vadd.f32 %v590_v57, %v584_v58  ;;  %v767_v3 = vsel %vm549_vm9, 1.0, %v860_v5 }
 0x1fa   : > { %v586_v60 = vmul.f32 %v767_v3, %v519_v54  ;;  %v571_v19 = vadd.f32 %v766_v62, %v570_v6 }
 0x1fb   : > { %v592_v14 = vadd.f32 %v591_v63, %v585_v7 }
 0x1fc   : > { %v572_v25 = vadd.f32 %v767_v3, %v571_v19 }
 0x1fd   : > { %v593_v22 = vadd.f32 %v592_v14, %v586_v60 }
 0x1fe   : > { %v573_v27 = vrot.slane %v572_v25, 4 }
 0x1ff   : > { %v594_v17 = vrot.slane %v593_v22, 4 }
 0x201   : > { %v595_v24 = vadd.f32 %v594_v17, %v593_v22 }
 0x254   : > { %v613_v59 = vpop.permute.xlu1 %612 }
 0x255   : > { %v642_v20 = vmul.f32 %v762_v41, %v613_v59 }
 0x256   : > { %v799_v4 = vpop.permute.xlu0 %798 }
 0x257   : > { %v801_v16 = vunpack.i.h.bf16 %v799_v4  ;;  %v800_v11 = vunpack.i.l.bf16 %v799_v4 }
 0x258   : > { %v618_v0 = vpop.permute.xlu1 %617 }
 0x259   : > { %v641_v15 = vmul.f32 %v801_v16, %v1137_v9  ;;  %v640_v1 = vmul.f32 %v800_v11, %v760_v35  ;;  %v643_v23 = vmul.f32 %v763_v45, %v618_v0  ;;  %v574_v9 = vadd.f32 %v573_v27, %v572_v25 }
 0x25a   : > { %v596_v35 = vrot.slane %v595_v24, 2 }
 0x25b   : > { %v648_v2 = vadd.f32 %v641_v15, %v640_v1  ;;  %v575_v12 = vrot.slane %v574_v9, 2 }
 0x25c   : > { %v623_v21 = vpop.permute.xlu1 %622  ;;  %v597_v39 = vadd.f32 %v596_v35, %v595_v24 }
 0x25d   : > { %v649_v10 = vadd.f32 %v648_v2, %v642_v20  ;;  %v644_v26 = vmul.f32 %v764_v52, %v623_v21  ;;  %v576_v42 = vadd.f32 %v575_v12, %v574_v9 }
 0x25e   : > { %v598_v44 = vrot.slane %v597_v39, 1 }
 0x25f   : > { %v650_v5 = vadd.f32 %v649_v10, %v643_v23  ;;  %v577_v46 = vrot.slane %v576_v42, 1 }
 0x260   : > { %v628_v18 = vpop.permute.xlu1 %627  ;;  %v599_v40 = vadd.f32 %v598_v44, %v597_v39 }
 0x261   : > { %v651_v28 = vadd.f32 %v650_v5, %v644_v26  ;;  %v645_v29 = vmul.f32 %v765_v55, %v628_v18  ;;  %v578_v48 = vadd.f32 %v577_v46, %v576_v42 }
 0x263   : > { %v652_v31 = vadd.f32 %v651_v28, %v645_v29  ;;  %v662_v50 = vsel %vm661_vm10, %v578_v48, %v599_v40 }
 0x264   : > { %v633_v8 = vpop.permute.xlu1 %632 }
 0x265   : > { %v646_v30 = vmul.f32 %v766_v62, %v633_v8 }
 0x267   : > { %v653_v36 = vadd.f32 %v652_v31, %v646_v30 }
 0x268   : > { %v638_v32 = vpop.permute.xlu1 %637 }
 0x269   : > { %v647_v37 = vmul.f32 %v767_v3, %v638_v32 }
 0x26b   : > { %v654_v38 = vadd.f32 %v653_v36, %v647_v37 }
 0x26d   : > { %v655_v41 = vrot.slane %v654_v38, 4 }
 0x26f   : > { %v656_v33 = vadd.f32 %v655_v41, %v654_v38 }
 0x271   : > { %v657_v45 = vrot.slane %v656_v33, 2 }
 0x273   : > { %v658_v13 = vadd.f32 %v657_v45, %v656_v33 }
 0x275   : > { %v659_v47 = vrot.slane %v658_v13, 1 }
 0x277   : > { %v660_v49 = vadd.f32 %v659_v47, %v658_v13 }
 0x279   : > { %v664_v51 = vsel %vm663_vm11, %v662_v50, %v660_v49 }
 0x27a   : > { %v666_v52 = vadd.f32 %v665_v34, %v664_v51 }
 0x27c   : > { %667 = vst [vmem:[%s1102_s26] sm:$0x7] %v666_v52 }
 0x27d PF: > { %s12_s11 = sadd.s32 1, %s857_s11   ;;  %s1177_s9 = smov %s853_s10 }
 0x27e   : > { %p9_p7 = scmp.ge.s32.totalorder %s12_s11, 4   ;;  %s1178_s10 = smov %s1180_s12 }
 0x280   :  { %11 = sbr.rel (!%p9_p7) target bundleno = 2 (0x2), region = 65 }

</bundles_post_ra>
